<compile_context>
chip_gen: v6e
topology: v6e:2x2x1
jax: 0.10.0
libtpu: 0.0.40
codegen_flags: <defaults>
</compile_context>

<pallas_src>
import functools

import jax
import jax.numpy as jnp
from jax.experimental import pallas as pl
from jax.experimental.pallas import tpu as pltpu


_LANES = 128      # lane width — all feature dims padded to this
_SUBLANES = 8     # sublane granularity — node / graph counts padded to this


def _pad_to(v, m):
    return ((v + m - 1) // m) * m


def _full_spec(shape):
    # Whole array resident in VMEM, single (implicit) grid point.
    return pl.BlockSpec(shape, lambda: (0,) * len(shape))


# ----------------------------------------------------------------------------
# Fused kernel: 3 x (GATConv + ReLU) + global_mean_pool, all in VMEM.
# ----------------------------------------------------------------------------
def _make_fused_gnn_kernel(f_outs, negative_slope=0.2):
    num_layers = len(f_outs)

    def kernel(*refs):
        # refs = (x, adj, pool, w0, b0, ..., wL-1, bL-1, out, h_scratch)
        x_ref, adj_ref, pool_ref = refs[0], refs[1], refs[2]
        wb_refs = refs[3:3 + 2 * num_layers]
        out_ref = refs[3 + 2 * num_layers]
        h_scr = refs[4 + 2 * num_layers]

        # adjacency mask (bf16 on the wire, f32 compare in-kernel), hoisted
        # out of the layer loop.
        adj_mask = adj_ref[...].astype(jnp.float32) > 0.0          # (N, N)
        neg_big = jnp.float32(-1e30)

        x = x_ref[...].astype(jnp.float32)                          # (N, 128)
        for l in range(num_layers):
            w = wb_refs[2 * l][...]                                 # (128,128) bf16
            b = wb_refs[2 * l + 1][...]                             # (1,128)  f32
            f_out = f_outs[l]

            # One bf16 MXU matmul produces h (cols [0:f_out)) plus the
            # per-node attention terms in cols f_out (src) and f_out+1 (dst).
            h_aug = jnp.dot(x.astype(jnp.bfloat16), w,
                            preferred_element_type=jnp.float32)     # (N, 128)

            # Stash in VMEM scratch so the two width-1 attention columns can
            # be pulled out with plain static ref slices.
            h_scr[...] = h_aug
            a_src = h_scr[:, f_out:f_out + 1]                       # (N, 1)
            a_dst = h_scr[:, f_out + 1:f_out + 2]                   # (N, 1)

            # e[i, j] = LeakyReLU(a_dst[i] + a_src[j])   (f32 VPU work)
            e = a_dst + jnp.transpose(a_src)                        # (N, N)
            e = jnp.maximum(e, negative_slope * e)                  # LeakyReLU
            e = jnp.where(adj_mask, e, neg_big)                     # mask non-edges

            # Softmax over incoming neighbors j (numerically safe: every row
            # has at least its self-loop).
            e = e - jnp.max(e, axis=-1, keepdims=True)
            p = jnp.exp(e)
            alpha = p * pl.reciprocal(jnp.sum(p, axis=-1, keepdims=True),
                                      approx=True)

            # Aggregate (bf16 MXU), bias, ReLU.  Columns >= f_out of h_aug
            # only carry the attention fold / zero padding; they never reach
            # the next layer's result because the next W_aug has zero rows
            # there, and they are sliced away after pooling.
            agg = jnp.dot(alpha.astype(jnp.bfloat16),
                          h_aug.astype(jnp.bfloat16),
                          preferred_element_type=jnp.float32)       # (N, 128)
            x = jnp.maximum(agg + b, 0.0)

        # global_mean_pool as one small matmul; output is lane-dense (G_pad,128).
        out_ref[...] = jnp.dot(pool_ref[...], x,
                               preferred_element_type=jnp.float32)

    return kernel


# ----------------------------------------------------------------------------
# Parameter / input preparation (plain JAX glue)
# ----------------------------------------------------------------------------
def init_params(key, num_features, num_classes, num_layers=3):
    """Matches the PyTorch module: widths double each hidden layer."""
    params = []
    f_in = num_features
    for i in range(num_layers):
        f_out = f_in * 2 if i < num_layers - 1 else num_classes
        key, k1, k2, k3 = jax.random.split(key, 4)
        scale = 1.0 / jnp.sqrt(jnp.float32(f_in))
        w = jax.random.normal(k1, (f_in, f_out), jnp.float32) * scale
        a_src = jax.random.normal(k2, (1, f_out), jnp.float32) * scale
        a_dst = jax.random.normal(k3, (1, f_out), jnp.float32) * scale
        bias = jnp.zeros((1, f_out), jnp.float32)
        params.append((w, a_src, a_dst, bias))
        f_in = f_out
    return params


def pack_params(params):
    """Pad to 128 lanes and fold the attention vectors into the weight."""
    packed = []
    f_outs = []
    for (w, a_src, a_dst, bias) in params:
        f_in, f_out = w.shape
        assert f_in <= _LANES and f_out + 2 <= _LANES
        w_aug = jnp.zeros((_LANES, _LANES), jnp.float32)
        w_aug = w_aug.at[:f_in, :f_out].set(w)
        w_aug = w_aug.at[:f_in, f_out].set(w @ a_src[0])      # per-node src term
        w_aug = w_aug.at[:f_in, f_out + 1].set(w @ a_dst[0])  # per-node dst term
        b_pad = jnp.zeros((1, _LANES), jnp.float32).at[:, :f_out].set(bias)
        packed.append((w_aug.astype(jnp.bfloat16), b_pad))
        f_outs.append(f_out)
    return tuple(packed), tuple(f_outs)


def build_adjacency(edge_index, num_nodes_pad):
    """adj[dst, src] = 1 for each edge src->dst, plus self-loops (incl. padding
    nodes, so no softmax row is empty).  Shipped as bf16 to halve DMA bytes."""
    adj = jnp.zeros((num_nodes_pad, num_nodes_pad), jnp.bfloat16)
    adj = adj.at[edge_index[1], edge_index[0]].set(1.0)
    idx = jnp.arange(num_nodes_pad)
    adj = adj.at[idx, idx].set(1.0)
    return adj


def build_pool_matrix(batch_index, num_graphs_pad, num_nodes_pad):
    num_nodes = batch_index.shape[0]
    one_hot = (batch_index[None, :] ==
               jnp.arange(num_graphs_pad)[:, None]).astype(jnp.float32)
    counts = jnp.maximum(one_hot.sum(axis=-1, keepdims=True), 1.0)
    pool = one_hot / counts                                    # (G_pad, N)
    return jnp.pad(pool, ((0, 0), (0, num_nodes_pad - num_nodes)))


def pad_features(x, num_nodes_pad):
    n, f = x.shape
    return jnp.pad(x, ((0, num_nodes_pad - n), (0, _LANES - f)))


# ----------------------------------------------------------------------------
# Forward pass: one fused pallas_call
# ----------------------------------------------------------------------------
@functools.partial(jax.jit, static_argnames=("f_outs", "num_classes", "num_graphs"))
def gnn_forward(packed_params, x_pad, adj, pool_mat, f_outs, num_classes,
                num_graphs):
    n_pad = x_pad.shape[0]
    g_pad = pool_mat.shape[0]

    kernel = _make_fused_gnn_kernel(f_outs)

    flat_params = []
    in_specs = [_full_spec(x_pad.shape),
                _full_spec(adj.shape),
                _full_spec(pool_mat.shape)]
    for (w, b) in packed_params:
        flat_params += [w, b]
        in_specs += [_full_spec(w.shape), _full_spec(b.shape)]

    pooled = pl.pallas_call(
        kernel,
        out_shape=jax.ShapeDtypeStruct((g_pad, _LANES), jnp.float32),
        in_specs=in_specs,
        out_specs=_full_spec((g_pad, _LANES)),
        scratch_shapes=[pltpu.VMEM((n_pad, _LANES), jnp.float32)],
        compiler_params=pltpu.CompilerParams(
            vmem_limit_bytes=32 * 1024 * 1024),
    )(x_pad, adj, pool_mat, *flat_params)

    # Strip the lane / graph padding in plain JAX.
    return pooled[:num_graphs, :num_classes]


# ----------------------------------------------------------------------------
if __name__ == "__main__":
    num_features = 4
    num_classes = 3
    num_layers = 3
    num_nodes = 16
    num_graphs = 2

    key = jax.random.PRNGKey(0)
    key, kx = jax.random.split(key)

    # Node features (N, F)
    x = jax.random.normal(kx, (num_nodes, num_features), jnp.float32)

    # Two graphs of 8 nodes each; bidirectional ring edges within each graph.
    nodes_per_graph = num_nodes // num_graphs
    src, dst = [], []
    for g in range(num_graphs):
        off = g * nodes_per_graph
        for i in range(nodes_per_graph):
            src.append(off + i)
            dst.append(off + (i + 1) % nodes_per_graph)
            src.append(off + (i + 1) % nodes_per_graph)
            dst.append(off + i)
    edge_index = jnp.array([src, dst], dtype=jnp.int32)              # (2, E)
    batch_index = jnp.repeat(jnp.arange(num_graphs, dtype=jnp.int32),
                             nodes_per_graph)                        # (N,)

    params = init_params(key, num_features, num_classes, num_layers)
    packed_params, f_outs = pack_params(params)

    n_pad = _pad_to(num_nodes, _SUBLANES)
    g_pad = _pad_to(num_graphs, _SUBLANES)

    x_pad = pad_features(x, n_pad)
    adj = build_adjacency(edge_index, n_pad)
    pool_mat = build_pool_matrix(batch_index, g_pad, n_pad)

    out = gnn_forward(packed_params, x_pad, adj, pool_mat, f_outs,
                      num_classes, num_graphs)
    out = jax.block_until_ready(out)
    assert out.shape == (num_graphs, num_classes)
    assert bool(jnp.all(jnp.isfinite(out)))
    print("KERNEL_OK")
</pallas_src>

<mosaic_0001>
module attributes {stable_mosaic.version = 11 : i64} {
  func.func @kernel(%arg0: memref<16x128xf32, #tpu.memory_space<vmem>>, %arg1: memref<16x16xbf16, #tpu.memory_space<vmem>>, %arg2: memref<8x16xf32, #tpu.memory_space<vmem>>, %arg3: memref<128x128xbf16, #tpu.memory_space<vmem>>, %arg4: memref<1x128xf32, #tpu.memory_space<vmem>>, %arg5: memref<128x128xbf16, #tpu.memory_space<vmem>>, %arg6: memref<1x128xf32, #tpu.memory_space<vmem>>, %arg7: memref<128x128xbf16, #tpu.memory_space<vmem>>, %arg8: memref<1x128xf32, #tpu.memory_space<vmem>>, %arg9: memref<8x128xf32, #tpu.memory_space<vmem>>, %arg10: memref<16x128xf32, #tpu.memory_space<vmem>>) attributes {dimension_semantics = [], scalar_prefetch = 0 : i64, scratch_operands = 1 : i64, tpu.core_type = #tpu.core_type<tc>} {
    %c0 = arith.constant 0 : index
    %c0_0 = arith.constant 0 : index
    %0 = vector.load %arg1[%c0, %c0_0] : memref<16x16xbf16, #tpu.memory_space<vmem>>, vector<16x16xbf16>
    %1 = arith.extf %0 : vector<16x16xbf16> to vector<16x16xf32>
    %cst = arith.constant 0.000000e+00 : f32
    %2 = vector.broadcast %cst : f32 to vector<16x16xf32>
    %3 = arith.cmpf ogt, %1, %2 : vector<16x16xf32>
    %c0_1 = arith.constant 0 : index
    %c0_2 = arith.constant 0 : index
    %4 = vector.load %arg0[%c0_1, %c0_2] : memref<16x128xf32, #tpu.memory_space<vmem>>, vector<16x128xf32>
    %c0_3 = arith.constant 0 : index
    %c0_4 = arith.constant 0 : index
    %5 = vector.load %arg3[%c0_3, %c0_4] : memref<128x128xbf16, #tpu.memory_space<vmem>>, vector<128x128xbf16>
    %c0_5 = arith.constant 0 : index
    %c0_6 = arith.constant 0 : index
    %6 = vector.load %arg4[%c0_5, %c0_6] : memref<1x128xf32, #tpu.memory_space<vmem>>, vector<1x128xf32>
    %7 = arith.truncf %4 : vector<16x128xf32> to vector<16x128xbf16>
    %cst_7 = arith.constant dense<0.000000e+00> : vector<16x128xf32>
    %8 = tpu.matmul %7, %5, %cst_7 {dimension_numbers = #tpu.dot_dimension_numbers<[1], [0], [0], [1], [0, 0, 1, 1], [], []>} : vector<16x128xbf16>, vector<128x128xbf16>, vector<16x128xf32> -> vector<16x128xf32>
    %c0_8 = arith.constant 0 : index
    %c0_9 = arith.constant 0 : index
    %9 = vector.load %arg10[%c0_8, %c0_9] : memref<16x128xf32, #tpu.memory_space<vmem>>, vector<16x128xf32>
    tpu.vector_store %arg10[%c0_8, %c0_9], %8 {strides = array<i32>} : memref<16x128xf32, #tpu.memory_space<vmem>>, vector<16x128xf32>,
    %c0_10 = arith.constant 0 : index
    %c8 = arith.constant 8 : index
    %10 = vector.load %arg10[%c0_10, %c8] : memref<16x128xf32, #tpu.memory_space<vmem>>, vector<16x1xf32>
    %c0_11 = arith.constant 0 : index
    %c9 = arith.constant 9 : index
    %11 = vector.load %arg10[%c0_11, %c9] : memref<16x128xf32, #tpu.memory_space<vmem>>, vector<16x1xf32>
    %12 = tpu.transpose %10, [1, 0] : vector<16x1xf32> -> vector<1x16xf32>
    %13 = vector.broadcast %11 : vector<16x1xf32> to vector<16x16xf32>
    %14 = vector.broadcast %12 : vector<1x16xf32> to vector<16x16xf32>
    %15 = arith.addf %13, %14 : vector<16x16xf32>
    %cst_12 = arith.constant 2.000000e-01 : f32
    %16 = vector.broadcast %cst_12 : f32 to vector<16x16xf32>
    %17 = arith.mulf %16, %15 : vector<16x16xf32>
    %18 = arith.maximumf %15, %17 : vector<16x16xf32>
    %cst_13 = arith.constant -1.000000e+30 : f32
    %19 = vector.broadcast %cst_13 : f32 to vector<16x16xf32>
    %20 = arith.select %3, %18, %19 : vector<16x16xi1>, vector<16x16xf32>
    %cst_14 = arith.constant dense<0xFF800000> : vector<16xf32>
    %21 = vector.multi_reduction <maximumf>, %20, %cst_14 [1] : vector<16x16xf32> to vector<16xf32>
    %22 = vector.shape_cast %21 : vector<16xf32> to vector<16x1xf32>
    %23 = vector.broadcast %22 : vector<16x1xf32> to vector<16x16xf32>
    %24 = arith.subf %20, %23 : vector<16x16xf32>
    %25 = math.exp %24 : vector<16x16xf32>
    %cst_15 = arith.constant dense<0.000000e+00> : vector<16xf32>
    %26 = vector.multi_reduction <add>, %25, %cst_15 [1] : vector<16x16xf32> to vector<16xf32>
    %27 = vector.shape_cast %26 : vector<16xf32> to vector<16x1xf32>
    %28 = tpu.reciprocal %27 {approx = true} : vector<16x1xf32> -> vector<16x1xf32>
    %29 = vector.broadcast %28 : vector<16x1xf32> to vector<16x16xf32>
    %30 = arith.mulf %25, %29 : vector<16x16xf32>
    %31 = arith.truncf %30 : vector<16x16xf32> to vector<16x16xbf16>
    %32 = arith.truncf %8 : vector<16x128xf32> to vector<16x128xbf16>
    %cst_16 = arith.constant dense<0.000000e+00> : vector<16x128xf32>
    %33 = tpu.matmul %31, %32, %cst_16 {dimension_numbers = #tpu.dot_dimension_numbers<[1], [0], [0], [1], [0, 0, 1, 1], [], []>} : vector<16x16xbf16>, vector<16x128xbf16>, vector<16x128xf32> -> vector<16x128xf32>
    %34 = vector.broadcast %6 : vector<1x128xf32> to vector<16x128xf32>
    %35 = arith.addf %33, %34 : vector<16x128xf32>
    %cst_17 = arith.constant 0.000000e+00 : f32
    %36 = vector.broadcast %cst_17 : f32 to vector<16x128xf32>
    %37 = arith.maximumf %35, %36 : vector<16x128xf32>
    %c0_18 = arith.constant 0 : index
    %c0_19 = arith.constant 0 : index
    %38 = vector.load %arg5[%c0_18, %c0_19] : memref<128x128xbf16, #tpu.memory_space<vmem>>, vector<128x128xbf16>
    %c0_20 = arith.constant 0 : index
    %c0_21 = arith.constant 0 : index
    %39 = vector.load %arg6[%c0_20, %c0_21] : memref<1x128xf32, #tpu.memory_space<vmem>>, vector<1x128xf32>
    %40 = arith.truncf %37 : vector<16x128xf32> to vector<16x128xbf16>
    %cst_22 = arith.constant dense<0.000000e+00> : vector<16x128xf32>
    %41 = tpu.matmul %40, %38, %cst_22 {dimension_numbers = #tpu.dot_dimension_numbers<[1], [0], [0], [1], [0, 0, 1, 1], [], []>} : vector<16x128xbf16>, vector<128x128xbf16>, vector<16x128xf32> -> vector<16x128xf32>
    %c0_23 = arith.constant 0 : index
    %c0_24 = arith.constant 0 : index
    %42 = vector.load %arg10[%c0_23, %c0_24] : memref<16x128xf32, #tpu.memory_space<vmem>>, vector<16x128xf32>
    tpu.vector_store %arg10[%c0_23, %c0_24], %41 {strides = array<i32>} : memref<16x128xf32, #tpu.memory_space<vmem>>, vector<16x128xf32>,
    %c0_25 = arith.constant 0 : index
    %c16 = arith.constant 16 : index
    %43 = vector.load %arg10[%c0_25, %c16] : memref<16x128xf32, #tpu.memory_space<vmem>>, vector<16x1xf32>
    %c0_26 = arith.constant 0 : index
    %c17 = arith.constant 17 : index
    %44 = vector.load %arg10[%c0_26, %c17] : memref<16x128xf32, #tpu.memory_space<vmem>>, vector<16x1xf32>
    %45 = tpu.transpose %43, [1, 0] : vector<16x1xf32> -> vector<1x16xf32>
    %46 = vector.broadcast %44 : vector<16x1xf32> to vector<16x16xf32>
    %47 = vector.broadcast %45 : vector<1x16xf32> to vector<16x16xf32>
    %48 = arith.addf %46, %47 : vector<16x16xf32>
    %cst_27 = arith.constant 2.000000e-01 : f32
    %49 = vector.broadcast %cst_27 : f32 to vector<16x16xf32>
    %50 = arith.mulf %49, %48 : vector<16x16xf32>
    %51 = arith.maximumf %48, %50 : vector<16x16xf32>
    %cst_28 = arith.constant -1.000000e+30 : f32
    %52 = vector.broadcast %cst_28 : f32 to vector<16x16xf32>
    %53 = arith.select %3, %51, %52 : vector<16x16xi1>, vector<16x16xf32>
    %cst_29 = arith.constant dense<0xFF800000> : vector<16xf32>
    %54 = vector.multi_reduction <maximumf>, %53, %cst_29 [1] : vector<16x16xf32> to vector<16xf32>
    %55 = vector.shape_cast %54 : vector<16xf32> to vector<16x1xf32>
    %56 = vector.broadcast %55 : vector<16x1xf32> to vector<16x16xf32>
    %57 = arith.subf %53, %56 : vector<16x16xf32>
    %58 = math.exp %57 : vector<16x16xf32>
    %cst_30 = arith.constant dense<0.000000e+00> : vector<16xf32>
    %59 = vector.multi_reduction <add>, %58, %cst_30 [1] : vector<16x16xf32> to vector<16xf32>
    %60 = vector.shape_cast %59 : vector<16xf32> to vector<16x1xf32>
    %61 = tpu.reciprocal %60 {approx = true} : vector<16x1xf32> -> vector<16x1xf32>
    %62 = vector.broadcast %61 : vector<16x1xf32> to vector<16x16xf32>
    %63 = arith.mulf %58, %62 : vector<16x16xf32>
    %64 = arith.truncf %63 : vector<16x16xf32> to vector<16x16xbf16>
    %65 = arith.truncf %41 : vector<16x128xf32> to vector<16x128xbf16>
    %cst_31 = arith.constant dense<0.000000e+00> : vector<16x128xf32>
    %66 = tpu.matmul %64, %65, %cst_31 {dimension_numbers = #tpu.dot_dimension_numbers<[1], [0], [0], [1], [0, 0, 1, 1], [], []>} : vector<16x16xbf16>, vector<16x128xbf16>, vector<16x128xf32> -> vector<16x128xf32>
    %67 = vector.broadcast %39 : vector<1x128xf32> to vector<16x128xf32>
    %68 = arith.addf %66, %67 : vector<16x128xf32>
    %cst_32 = arith.constant 0.000000e+00 : f32
    %69 = vector.broadcast %cst_32 : f32 to vector<16x128xf32>
    %70 = arith.maximumf %68, %69 : vector<16x128xf32>
    %c0_33 = arith.constant 0 : index
    %c0_34 = arith.constant 0 : index
    %71 = vector.load %arg7[%c0_33, %c0_34] : memref<128x128xbf16, #tpu.memory_space<vmem>>, vector<128x128xbf16>
    %c0_35 = arith.constant 0 : index
    %c0_36 = arith.constant 0 : index
    %72 = vector.load %arg8[%c0_35, %c0_36] : memref<1x128xf32, #tpu.memory_space<vmem>>, vector<1x128xf32>
    %73 = arith.truncf %70 : vector<16x128xf32> to vector<16x128xbf16>
    %cst_37 = arith.constant dense<0.000000e+00> : vector<16x128xf32>
    %74 = tpu.matmul %73, %71, %cst_37 {dimension_numbers = #tpu.dot_dimension_numbers<[1], [0], [0], [1], [0, 0, 1, 1], [], []>} : vector<16x128xbf16>, vector<128x128xbf16>, vector<16x128xf32> -> vector<16x128xf32>
    %c0_38 = arith.constant 0 : index
    %c0_39 = arith.constant 0 : index
    %75 = vector.load %arg10[%c0_38, %c0_39] : memref<16x128xf32, #tpu.memory_space<vmem>>, vector<16x128xf32>
    tpu.vector_store %arg10[%c0_38, %c0_39], %74 {strides = array<i32>} : memref<16x128xf32, #tpu.memory_space<vmem>>, vector<16x128xf32>,
    %c0_40 = arith.constant 0 : index
    %c3 = arith.constant 3 : index
    %76 = vector.load %arg10[%c0_40, %c3] : memref<16x128xf32, #tpu.memory_space<vmem>>, vector<16x1xf32>
    %c0_41 = arith.constant 0 : index
    %c4 = arith.constant 4 : index
    %77 = vector.load %arg10[%c0_41, %c4] : memref<16x128xf32, #tpu.memory_space<vmem>>, vector<16x1xf32>
    %78 = tpu.transpose %76, [1, 0] : vector<16x1xf32> -> vector<1x16xf32>
    %79 = vector.broadcast %77 : vector<16x1xf32> to vector<16x16xf32>
    %80 = vector.broadcast %78 : vector<1x16xf32> to vector<16x16xf32>
    %81 = arith.addf %79, %80 : vector<16x16xf32>
    %cst_42 = arith.constant 2.000000e-01 : f32
    %82 = vector.broadcast %cst_42 : f32 to vector<16x16xf32>
    %83 = arith.mulf %82, %81 : vector<16x16xf32>
    %84 = arith.maximumf %81, %83 : vector<16x16xf32>
    %cst_43 = arith.constant -1.000000e+30 : f32
    %85 = vector.broadcast %cst_43 : f32 to vector<16x16xf32>
    %86 = arith.select %3, %84, %85 : vector<16x16xi1>, vector<16x16xf32>
    %cst_44 = arith.constant dense<0xFF800000> : vector<16xf32>
    %87 = vector.multi_reduction <maximumf>, %86, %cst_44 [1] : vector<16x16xf32> to vector<16xf32>
    %88 = vector.shape_cast %87 : vector<16xf32> to vector<16x1xf32>
    %89 = vector.broadcast %88 : vector<16x1xf32> to vector<16x16xf32>
    %90 = arith.subf %86, %89 : vector<16x16xf32>
    %91 = math.exp %90 : vector<16x16xf32>
    %cst_45 = arith.constant dense<0.000000e+00> : vector<16xf32>
    %92 = vector.multi_reduction <add>, %91, %cst_45 [1] : vector<16x16xf32> to vector<16xf32>
    %93 = vector.shape_cast %92 : vector<16xf32> to vector<16x1xf32>
    %94 = tpu.reciprocal %93 {approx = true} : vector<16x1xf32> -> vector<16x1xf32>
    %95 = vector.broadcast %94 : vector<16x1xf32> to vector<16x16xf32>
    %96 = arith.mulf %91, %95 : vector<16x16xf32>
    %97 = arith.truncf %96 : vector<16x16xf32> to vector<16x16xbf16>
    %98 = arith.truncf %74 : vector<16x128xf32> to vector<16x128xbf16>
    %cst_46 = arith.constant dense<0.000000e+00> : vector<16x128xf32>
    %99 = tpu.matmul %97, %98, %cst_46 {dimension_numbers = #tpu.dot_dimension_numbers<[1], [0], [0], [1], [0, 0, 1, 1], [], []>} : vector<16x16xbf16>, vector<16x128xbf16>, vector<16x128xf32> -> vector<16x128xf32>
    %100 = vector.broadcast %72 : vector<1x128xf32> to vector<16x128xf32>
    %101 = arith.addf %99, %100 : vector<16x128xf32>
    %cst_47 = arith.constant 0.000000e+00 : f32
    %102 = vector.broadcast %cst_47 : f32 to vector<16x128xf32>
    %103 = arith.maximumf %101, %102 : vector<16x128xf32>
    %c0_48 = arith.constant 0 : index
    %c0_49 = arith.constant 0 : index
    %104 = vector.load %arg2[%c0_48, %c0_49] : memref<8x16xf32, #tpu.memory_space<vmem>>, vector<8x16xf32>
    %cst_50 = arith.constant dense<0.000000e+00> : vector<8x128xf32>
    %105 = tpu.matmul %104, %103, %cst_50 {dimension_numbers = #tpu.dot_dimension_numbers<[1], [0], [0], [1], [0, 0, 1, 1], [], []>} : vector<8x16xf32>, vector<16x128xf32>, vector<8x128xf32> -> vector<8x128xf32>
    %c0_51 = arith.constant 0 : index
    %c0_52 = arith.constant 0 : index
    %106 = vector.load %arg9[%c0_51, %c0_52] : memref<8x128xf32, #tpu.memory_space<vmem>>, vector<8x128xf32>
    tpu.vector_store %arg9[%c0_51, %c0_52], %105 {strides = array<i32>} : memref<8x128xf32, #tpu.memory_space<vmem>>, vector<8x128xf32>,
    return
  }
}

</mosaic_0001>

<bundles_post_ra>
// kernel: gnn_forward.1
= control target key start
LH: loop header
LB: loop body
LE: loop exit
PB: predicated region body
PF: predicated region fallthrough
CT: control target
= control target key end

     0   :  { %14 = vsyncpa [#allocation4], 0  ;;  %s1452_s0 = inlined_call_operand.hbm [shape: f32[16,128], index: 0, kind: input, shape index: {}]   ;;  %s1453_s1 = inlined_call_operand.vmem [shape: bf16[16,16], index: 1, kind: input, shape index: {}]   ;;  %s1454_s2 = inlined_call_operand.hbm [shape: f32[8,16], index: 2, kind: input, shape index: {}]   ;;  %s1455_s3 = inlined_call_operand.hbm [shape: bf16[128,128], index: 3, kind: input, shape index: {}]   ;;  %s1456_s4 = inlined_call_operand.vmem [shape: f32[1,128], index: 4, kind: input, shape index: {}]   ;;  %s1457_s5 = inlined_call_operand.hbm [shape: bf16[128,128], index: 5, kind: input, shape index: {}]   ;;  %s1458_s6 = inlined_call_operand.vmem [shape: f32[1,128], index: 6, kind: input, shape index: {}]   ;;  %s1459_s7 = inlined_call_operand.hbm [shape: bf16[128,128], index: 7, kind: input, shape index: {}]   ;;  %s1460_s8 = inlined_call_operand.vmem [shape: f32[1,128], index: 8, kind: input, shape index: {}]   ;;  %s1461_s9 = inlined_call_operand.vmem [shape: f32[8,128], index: 9, kind: output, shape index: {}]  }
   0x1   :  { %15 = vsyncpa [#allocation6], 0 }
   0x2   :  { %16 = vsyncpa [#allocation9], 0  ;;  %s1262_s30 = smov [#allocation5]  }
   0x3   :  { %s37_s10 = sshll.u32 %s1262_s30, 4  ;;  %s38_s10 = int_to_ptr.vmem [resolvable:$true] %s37_s10 }
   0x4   :  { %s1164_s11 = scalar_lea.vmem %s38_s10, 128  ;;  %p1169_p1 = scmp.lt.s32.totalorder %s38_s10, %s38_s10 }
   0x5   :  { %p1165_p0 = scmp.ne.s32.totalorder %s38_s10, %s1164_s11  ;;  %p1170_p2 = scmp.lt.s32.totalorder %s1164_s11, %s1164_s11 }
   0x7   :  { %p1171_p3 = por %p1170_p2, %p1169_p1 }
   0x9   :  { %p1172_p4 = pnand %p1171_p3, %p1165_p0 }
   0xb   :  { %1175 = shalt.err (!%p1172_p4)
}
   0xc   :  { %40 = dma.hbm_to_vmem [thread:$0]  %s1454_s2, 128, %s38_s10, [#allocation6]  }
   0xd   :  { %s1263_s14 = smov [#allocation8]   ;;  %s1264_s16 = smov [#allocation3]  }
   0xe   :  { %s60_s15 = sshll.u32 %s1263_s14, 4  ;;  %s22_s17 = sshll.u32 %s1264_s16, 4  ;;  %s61_s15 = int_to_ptr.vmem [resolvable:$true] %s60_s15  ;;  %s23_s17 = int_to_ptr.vmem [resolvable:$true] %s22_s17 }
   0xf   :  { %s1184_s18 = scalar_lea.vmem %s61_s15, 1024  ;;  %p1189_p6 = scmp.lt.s32.totalorder %s61_s15, %s61_s15 }
  0x10   :  { %p1185_p5 = scmp.ne.s32.totalorder %s61_s15, %s1184_s18  ;;  %p1190_p7 = scmp.lt.s32.totalorder %s1184_s18, %s1184_s18 }
  0x12   :  { %p1191_p8 = por %p1190_p7, %p1189_p6 }
  0x14   :  { %p1192_p9 = pnand %p1191_p8, %p1185_p5 }
  0x16   :  { %1195 = shalt.err (!%p1192_p9)
}
  0x17   :  { %s1265_s19 = smov 64   ;;  %s1266_s20 = smov 4  }
  0x18   :  { %66 = dma.hbm_to_vmem [thread:$0]  %s1457_s5, 1024, %s61_s15, [#allocation9], %s1265_s19, %s1265_s19, %s1266_s20  }
  0x19   :  { %s1204_s2 = scalar_lea.vmem %s23_s17, 256  ;;  %p1209_p11 = scmp.lt.s32.totalorder %s23_s17, %s23_s17 }
  0x1a   :  { %p1205_p10 = scmp.ne.s32.totalorder %s23_s17, %s1204_s2  ;;  %p1210_p12 = scmp.lt.s32.totalorder %s1204_s2, %s1204_s2 }
  0x1c   :  { %p1211_p13 = por %p1210_p12, %p1209_p11 }
  0x1e   :  { %p1212_p0 = pnand %p1211_p13, %p1205_p10 }
  0x20   :  { %1215 = shalt.err (!%p1212_p0)
}
  0x21   :  { %s1267_s23 = smov 128   ;;  %s1268_s24 = smov 8  }
  0x22   :  { %28 = dma.hbm_to_vmem [thread:$0]  %s1452_s0, 256, %s23_s17, [#allocation4], %s1267_s23, %s1267_s23, %s1268_s24  }
  0x23   :  { %s1269_s27 = smov [#allocation7]   ;;  %s1270_s29 = smov [#allocation10]  }
  0x24   :  { %s46_s28 = sshll.u32 %s1269_s27, 4  ;;  %s74_s30 = sshll.u32 %s1270_s29, 4  ;;  %s47_s28 = int_to_ptr.vmem [resolvable:$true] %s46_s28  ;;  %s75_s30 = int_to_ptr.vmem [resolvable:$true] %s74_s30 }
  0x25   :  { %s1224_s5 = scalar_lea.vmem %s47_s28, 1024  ;;  %p1229_p2 = scmp.lt.s32.totalorder %s47_s28, %s47_s28 }
  0x26   :  { %p1225_p1 = scmp.ne.s32.totalorder %s47_s28, %s1224_s5  ;;  %p1230_p3 = scmp.lt.s32.totalorder %s1224_s5, %s1224_s5 }
  0x28   :  { %p1231_p4 = por %p1230_p3, %p1229_p2 }
  0x2a   :  { %p1232_p5 = pnand %p1231_p4, %p1225_p1 }
  0x2c   :  { %1235 = shalt.err (!%p1232_p5)
}
  0x2d   :  { %52 = dma.hbm_to_vmem [thread:$0]  %s1455_s3, 1024, %s47_s28, [#allocation6], %s1265_s19, %s1265_s19, %s1266_s20  }
  0x2e   :  { %s1244_s0 = scalar_lea.vmem %s75_s30, 1024  ;;  %p1249_p7 = scmp.lt.s32.totalorder %s75_s30, %s75_s30 }
  0x2f   :  { %p1245_p6 = scmp.ne.s32.totalorder %s75_s30, %s1244_s0  ;;  %p1250_p8 = scmp.lt.s32.totalorder %s1244_s0, %s1244_s0 }
  0x31   :  { %p1251_p9 = por %p1250_p8, %p1249_p7 }
  0x33   :  { %p1252_p10 = pnand %p1251_p9, %p1245_p6 }
  0x35   :  { %1255 = shalt.err (!%p1252_p10)
}
  0x36   :  { %80 = dma.hbm_to_vmem [thread:$0]  %s1459_s7, 1024, %s75_s30, [#allocation9], %s1265_s19, %s1265_s19, %s1266_s20  }
  0x37   :  { %1256 = dma.done.wait [#allocation4], 256  }
  0x38   :  { %1257 = vsyncadd [#allocation4], 4294967040 }
  0x39   :  { %1258 = dma.done.wait [#allocation6], 1152  }
  0x3a   :  { %1259 = vsyncadd [#allocation6], 4294966144 }
  0x3b   :  { %1260 = dma.done.wait [#allocation9], 2048  }
  0x3c   :  { %1261 = vsyncadd [#allocation9], 4294965248  ;;  %v1271_v0 = vmov 0.0   ;;  %vm1272_vm0 = vmmov 0   ;;  %v1273_v1 = vmov 9   ;;  %v1108_v2 = vld [vmem:[#allocation7 + $0x38] sm:$0xff]   ;;  %v266_v20 = vlaneseq }
  0x3d   :  { %1002 = vmatprep.subr.bf16.mxu0 %v1271_v0  ;;  %1018 = vmatprep.mubr.msk.bf16.mxu0 %vm1272_vm0, %v1271_v0  ;;  %v1109_v3 = vld [vmem:[#allocation7 + $0x30] sm:$0xff]   ;;  %v1110_v4 = vld [vmem:[#allocation7 + $0x28] sm:$0xff]   ;;  %v1111_v5 = vld [vmem:[#allocation7 + $0x20] sm:$0xff]   ;;  %s1274_s3 = smov 120   ;;  %vm278_vm3 = vcmask 130048   ;;  %s1276_s16 = smov 112  }
  0x3e   :  { %1104 = vset.pattern.permute.xlu1 %v1273_v1  ;;  %1028 = vmatprep.subr.bf16.mxu1 %v1271_v0  ;;  %v1112_v6 = vld [vmem:[#allocation7 + $0x18] sm:$0xff]   ;;  %v1113_v7 = vld [vmem:[#allocation7 + $0x10] sm:$0xff]   ;;  %v1114_v8 = vld [vmem:[#allocation7 + $0x8] sm:$0xff]   ;;  %v267_v21 = vshrl.u32 %v266_v20, 7  ;;  %s1278_s18 = smov 125  }
  0x3f   :  { %1044 = vmatprep.mubr.msk.bf16.mxu1 %vm1272_vm0, %v1271_v0  ;;  %1003 = vmatpush3.bf16.msra.mxu0 %v1108_v2  ;;  %v1115_v9 = vld [vmem:[#allocation7] sm:$0xff]   ;;  %v105_v10 = vld [vmem:[#allocation3] sm:$0xff]  ;;  %v106_v11 = vld [vmem:[#allocation3 + $0x8] sm:$0xff] }
  0x40   :  { %1004 = vmatprep.subr.bf16.mxu0 %v1271_v0  ;;  %v124_v12 = vpack.c.bf16 %v106_v11, %v105_v10  ;;  %v1370_v23 = vsub.s32 0, %v267_v21  ;;  %v963_v24 = vld [vmem:[%s1453_s1] sm:$0xff]   ;;  %v1116_v52 = vld [vmem:[#allocation8 + $0x38] sm:$0xff]   ;;  %v1117_v53 = vld [vmem:[#allocation8 + $0x30] sm:$0xff]  }
  0x41   :  { %v965_v28 = vunpack.c.h.bf16 %v963_v24  ;;  %v964_v29 = vunpack.c.l.bf16 %v963_v24  ;;  %1029 = vmatpush3.bf16.msra.mxu1 %v1116_v52  ;;  %v1118_v54 = vld [vmem:[#allocation8 + $0x28] sm:$0xff]   ;;  %v1119_v55 = vld [vmem:[#allocation8 + $0x20] sm:$0xff]   ;;  %v1120_v56 = vld [vmem:[#allocation8 + $0x18] sm:$0xff]  }
  0x42   :  { %1030 = vmatprep.subr.bf16.mxu1 %v1271_v0  ;;  %v1121_v1 = vld [vmem:[#allocation8 + $0x10] sm:$0xff]   ;;  %v1122_v2 = vld [vmem:[#allocation8 + $0x8] sm:$0xff]   ;;  %v1127_v52 = vld [vmem:[#allocation10 + $0x20] sm:$0xff]  }
  0x43   :  { %1005 = vmatpush3.bf16.msra.mxu0 %v1109_v3  ;;  %vm1376_vm1 = vcmp.gt.f32.partialorder %v965_v28, 0.0  ;;  %vm1380_vm2 = vcmp.gt.f32.partialorder %v964_v29, 0.0  ;;  %v1123_v3 = vld [vmem:[#allocation8] sm:$0xff]  }
  0x44   :  { %1006 = vmatprep.subr.bf16.mxu0 %v1271_v0 }
  0x45   :  { %1031 = vmatpush3.bf16.msra.mxu1 %v1117_v53  ;;  %v1128_v53 = vld [vmem:[#allocation10 + $0x18] sm:$0xff]  }
  0x46   :  { %1032 = vmatprep.subr.bf16.mxu1 %v1271_v0 }
  0x47   :  { %1007 = vmatpush3.bf16.msra.mxu0 %v1110_v4  ;;  %v939_v4 = vld [vmem:[%s1456_s4] ss:$0 sm:$0xff] }
  0x48   :  { %1008 = vmatprep.subr.bf16.mxu0 %v1271_v0 }
  0x49   :  { %1033 = vmatpush3.bf16.msra.mxu1 %v1118_v54 }
  0x4a   :  { %1034 = vmatprep.subr.bf16.mxu1 %v1271_v0 }
  0x4b   :  { %1009 = vmatpush3.bf16.msra.mxu0 %v1111_v5 }
  0x4c   :  { %1010 = vmatprep.subr.bf16.mxu0 %v1271_v0 }
  0x4d   :  { %1035 = vmatpush3.bf16.msra.mxu1 %v1119_v55 }
  0x4e   :  { %1036 = vmatprep.subr.bf16.mxu1 %v1271_v0 }
  0x4f   :  { %1011 = vmatpush3.bf16.msra.mxu0 %v1112_v6 }
  0x50   :  { %1012 = vmatprep.subr.bf16.mxu0 %v1271_v0 }
  0x51   :  { %1037 = vmatpush3.bf16.msra.mxu1 %v1120_v56 }
  0x52   :  { %1038 = vmatprep.subr.bf16.mxu1 %v1271_v0 }
  0x53   :  { %1013 = vmatpush3.bf16.msra.mxu0 %v1113_v7 }
  0x54   :  { %1014 = vmatprep.subr.bf16.mxu0 %v1271_v0 }
  0x55   :  { %1039 = vmatpush3.bf16.msra.mxu1 %v1121_v1  ;;  %v1277_v1 = vmov 4  }
  0x56   :  { %1040 = vmatprep.subr.bf16.mxu1 %v1271_v0 }
  0x57   :  { %1015 = vmatpush3.bf16.msra.mxu0 %v1114_v8 }
  0x58   :  { %1016 = vmatprep.subr.bf16.mxu0 %v1271_v0 }
  0x59   :  { %1041 = vmatpush3.bf16.msra.mxu1 %v1122_v2  ;;  %v949_v2 = vld [vmem:[%s1458_s6] ss:$0 sm:$0xff] }
  0x5a   :  { %1042 = vmatprep.subr.bf16.mxu1 %v1271_v0 }
  0x5b   :  { %1017 = vmatpush3.bf16.msra.mxu0 %v1115_v9 }
  0x5c   :  { %1022 = vmatprep.subr.bf16.mxu0 %v1271_v0 }
  0x5d   :  { %1043 = vmatpush3.bf16.msra.mxu1 %v1123_v3 }
  0x5e   :  { %1019 = vmatmul.mubr.bf16.vlgmr.msra.gmra.mxu0 %v124_v12  ;;  %1054 = vmatprep.subr.bf16.mxu1 %v1271_v0 }
  0x5f   :  { %1024 = vmatprep.mubr.msk.bf16.mxu0 %vm1272_vm0, %v1271_v0 }
 0x11e   :  { %v207_v13 = vpop.f32.mrf.mxu0 }
 0x11f   :  { %259 = vperm.xlu1 %1104, %v207_v13   ;;  %220 = vrot.lane.b32.xlu0 %v207_v13, %s1274_s3 }
 0x120   :  { %v1020_v14 = vpop.f32.mrf.mxu0 }
 0x121   :  { %v1275_v14 = vmov 17  }
 0x122   :  { %v210_v15 = vpop.f32.mrf.mxu0 }
 0x123   :  { %v302_v16 = vpack.c.bf16 %v210_v15, %v207_v13  ;;  %263 = vperm.xlu1 %1104, %v210_v15   ;;  %222 = vrot.lane.b32.xlu0 %v210_v15, %s1274_s3 }
 0x124   :  { %v1021_v17 = vpop.f32.mrf.mxu0 }
 0x125   :  { %1023 = vmatpush3.bf16.msra.mxu0 %v302_v16 }
 0x126   :  { %1048 = vmatprep.subr.bf16.mxu0 %v1271_v0 }
 0x127   :  { %1105 = vset.pattern.permute.xlu1 %v1275_v14 }
 0x191   :  { %v221_v18 = vpop.permute.xlu0 %220 }
 0x192   :  { %226 = vxpose.xlu0.b32.start [1/2] (short) (narrow) %v221_v18, 8 }
 0x195   :  { %v223_v19 = vpop.permute.xlu0 %222 }
 0x196   :  { %227 = vxpose.xlu0.b32.end [2/2] (short) (narrow) %v223_v19, 8 }
 0x19a   :  { %v260_v22 = vpop.permute.xlu1 %259 }
 0x19e   :  { %v264_v27 = vpop.permute.xlu1 %263 }
 0x1bf   :  { %1107 = vset.pattern.permute.xlu0 %v1277_v1 }
 0x20e   :  { %v242_v25 = vpop.trf.xlu0 }
 0x20f   :  { %v269_v26 = vrot.slane %v242_v25, %v1370_v23 }
 0x211   :  { %v270_v30 = vadd.f32 %v269_v26, %v260_v22  ;;  %v271_v31 = vadd.f32 %v269_v26, %v264_v27 }
 0x213   :  { %v272_v32 = vmul.f32 0.2, %v270_v30  ;;  %v273_v33 = vmul.f32 0.2, %v271_v31 }
 0x215   :  { %v275_v36 = vmax.f32 %v271_v31, %v273_v33  ;;  %v274_v37 = vmax.f32 %v270_v30, %v272_v32 }
 0x217   :  { %v277_v38 = vsel %vm1376_vm1, %v275_v36, -1e+30  ;;  %v276_v39 = vsel %vm1380_vm2, %v274_v37, -1e+30 }
 0x218   :  { %v282_v40 = vsel %vm278_vm3, %v277_v38, -inf  ;;  %v279_v41 = vsel %vm278_vm3, %v276_v39, -inf }
 0x219   :  { %283 = vmax.xlane.f32.xlu0 %v282_v40  ;;  %280 = vmax.xlane.f32.xlu1 %v279_v41 }
 0x2a2   :  { %v284_v42 = vpop.xlane.xlu0 %283  ;;  %v281_v43 = vpop.xlane.xlu1 %280 }
 0x2a3   :  { %v286_v44 = vsub.f32 %v277_v38, %v284_v42  ;;  %v285_v45 = vsub.f32 %v276_v39, %v281_v43 }
 0x2a5   :  { %v287_v46 = vmul.f32 1.442695, %v285_v45  ;;  %v289_v47 = vmul.f32 1.442695, %v286_v44 }
 0x2a7   :  { %1132 = vpow2.f32 %v287_v46 }
 0x2a8   :  { %1134 = vpow2.f32 %v289_v47 }
 0x2b4   :  { %v1133_v48 = vpop.eup %1132 }
 0x2b5   :  { %v291_v49 = vsel %vm278_vm3, %v1133_v48, 0.0  ;;  %v1135_v50 = vpop.eup %1134 }
 0x2b6   :  { %292 = vadd.xlane.f32.xlu1 %v291_v49  ;;  %v294_v51 = vsel %vm278_vm3, %v1135_v50, 0.0  ;;  %v1124_v49 = vld [vmem:[#allocation10 + $0x38] sm:$0xff]  }
 0x2ba   :  { %295 = vadd.xlane.f32.xlu1 %v294_v51  ;;  %v1126_v51 = vld [vmem:[#allocation10 + $0x28] sm:$0xff]  }
 0x33f   :  { %v293_v57 = vpop.xlane.xlu1 %292 }
 0x340   :  { %1136 = vrcp.f32 %v293_v57 }
 0x343   :  { %v296_v58 = vpop.xlane.xlu1 %295 }
 0x344   :  { %1138 = vrcp.f32 %v296_v58 }
 0x34d   :  { %v1137_v59 = vpop.eup %1136 }
 0x34e   :  { %v299_v61 = vmul.f32 %v1137_v59, %v1133_v48 }
 0x351   :  { %v1139_v60 = vpop.eup %1138 }
 0x352   :  { %v300_v62 = vmul.f32 %v1139_v60, %v1135_v50  ;;  %v1125_v50 = vld [vmem:[#allocation10 + $0x30] sm:$0xff]  }
 0x354   :  { %v301_v63 = vpack.c.bf16 %v300_v62, %v299_v61  ;;  %v1129_v61 = vld [vmem:[#allocation10 + $0x10] sm:$0xff]   ;;  %v1130_v62 = vld [vmem:[#allocation10 + $0x8] sm:$0xff]  }
 0x356   :  { %1025 = vmatmul.mubr.msk.bf16.vlgmr.msra.gmra.mxu0 %vm278_vm3, %v301_v63  ;;  %v1131_v63 = vld [vmem:[#allocation10] sm:$0xff]  }
 0x357   :  { %1050 = vmatprep.mubr.msk.bf16.mxu0 %vm1272_vm0, %v1271_v0 }
 0x416   :  { %v346_v5 = vpop.f32.mrf.mxu0 }
 0x417   :  { %v347_v7 = vadd.f32 %v939_v4, %v346_v5 }
 0x418   :  { %v1026_v6 = vpop.f32.mrf.mxu0 }
 0x419   :  { %v353_v11 = vmax.f32 %v347_v7, 0.0 }
 0x41a   :  { %v349_v8 = vpop.f32.mrf.mxu0 }
 0x41b   :  { %v350_v9 = vadd.f32 %v939_v4, %v349_v8 }
 0x41c   :  { %v1027_v10 = vpop.f32.mrf.mxu0 }
 0x41d   :  { %v354_v12 = vmax.f32 %v350_v9, 0.0 }
 0x41f   :  { %v372_v13 = vpack.c.bf16 %v354_v12, %v353_v11 }
 0x421   :  { %1045 = vmatmul.mubr.bf16.vlgmr.msra.gmra.mxu1 %v372_v13 }
 0x422   :  { %1070 = vmatprep.mubr.msk.bf16.mxu1 %vm1272_vm0, %v1271_v0  ;;  %1055 = vmatpush3.bf16.msra.mxu1 %v1124_v49 }
 0x423   :  { %1056 = vmatprep.subr.bf16.mxu1 %v1271_v0 }
 0x426   :  { %1057 = vmatpush3.bf16.msra.mxu1 %v1125_v50 }
 0x427   :  { %1058 = vmatprep.subr.bf16.mxu1 %v1271_v0 }
 0x42a   :  { %1059 = vmatpush3.bf16.msra.mxu1 %v1126_v51  ;;  %v959_v51 = vld [vmem:[%s1460_s8] ss:$0 sm:$0xff] }
 0x42b   :  { %1060 = vmatprep.subr.bf16.mxu1 %v1271_v0 }
 0x42e   :  { %1061 = vmatpush3.bf16.msra.mxu1 %v1127_v52 }
 0x42f   :  { %1062 = vmatprep.subr.bf16.mxu1 %v1271_v0 }
 0x432   :  { %1063 = vmatpush3.bf16.msra.mxu1 %v1128_v53 }
 0x433   :  { %1064 = vmatprep.subr.bf16.mxu1 %v1271_v0 }
 0x436   :  { %1065 = vmatpush3.bf16.msra.mxu1 %v1129_v61 }
 0x437   :  { %1066 = vmatprep.subr.bf16.mxu1 %v1271_v0 }
 0x43a   :  { %1067 = vmatpush3.bf16.msra.mxu1 %v1130_v62 }
 0x43b   :  { %1068 = vmatprep.subr.bf16.mxu1 %v1271_v0 }
 0x43e   :  { %1069 = vmatpush3.bf16.msra.mxu1 %v1131_v63 }
 0x4e1   :  { %v455_v15 = vpop.f32.mrf.mxu1 }
 0x4e2   :  { %468 = vrot.lane.b32.xlu1 %v455_v15, %s1276_s16 }
 0x4e3   :  { %v1046_v16 = vpop.f32.mrf.mxu1 }
 0x4e5   :  { %v458_v17 = vpop.f32.mrf.mxu1 }
 0x4e6   :  { %v549_v18 = vpack.c.bf16 %v458_v17, %v455_v15  ;;  %470 = vrot.lane.b32.xlu1 %v458_v17, %s1276_s16 }
 0x4e7   :  { %v1047_v19 = vpop.f32.mrf.mxu1 }
 0x4e8   :  { %1049 = vmatpush3.bf16.msra.mxu0 %v549_v18 }
 0x4e9   :  { %1074 = vmatprep.subr.bf16.mxu0 %v1271_v0 }
 0x4ea   :  { %507 = vperm.xlu1 %1105, %v455_v15  }
 0x4ee   :  { %511 = vperm.xlu1 %1105, %v458_v17  }
 0x554   :  { %v469_v20 = vpop.permute.xlu1 %468 }
 0x555   :  { %474 = vxpose.xlu1.b32.start [1/2] (short) (narrow) %v469_v20, 8 }
 0x558   :  { %v471_v21 = vpop.permute.xlu1 %470 }
 0x559   :  { %475 = vxpose.xlu1.b32.end [2/2] (short) (narrow) %v471_v21, 8 }
 0x565   :  { %v508_v22 = vpop.permute.xlu1 %507 }
 0x569   :  { %v512_v24 = vpop.permute.xlu1 %511 }
 0x577   :  { %1106 = vset.pattern.permute.xlu1 %v1277_v1 }
 0x5d1   :  { %v490_v25 = vpop.trf.xlu1 }
 0x5d2   :  { %v517_v26 = vrot.slane %v490_v25, %v1370_v23 }
 0x5d4   :  { %v518_v27 = vadd.f32 %v517_v26, %v508_v22  ;;  %v519_v28 = vadd.f32 %v517_v26, %v512_v24 }
 0x5d6   :  { %v520_v29 = vmul.f32 0.2, %v518_v27  ;;  %v521_v30 = vmul.f32 0.2, %v519_v28 }
 0x5d8   :  { %v522_v31 = vmax.f32 %v518_v27, %v520_v29  ;;  %v523_v32 = vmax.f32 %v519_v28, %v521_v30 }
 0x5da   :  { %v524_v33 = vsel %vm1380_vm2, %v522_v31, -1e+30  ;;  %v525_v37 = vsel %vm1376_vm1, %v523_v32, -1e+30 }
 0x5db   :  { %v526_v36 = vsel %vm278_vm3, %v524_v33, -inf  ;;  %v529_v38 = vsel %vm278_vm3, %v525_v37, -inf }
 0x5dc   :  { %527 = vmax.xlane.f32.xlu0 %v526_v36 }
 0x5e0   :  { %530 = vmax.xlane.f32.xlu0 %v529_v38 }
 0x665   :  { %v528_v39 = vpop.xlane.xlu0 %527 }
 0x666   :  { %v532_v40 = vsub.f32 %v524_v33, %v528_v39 }
 0x668   :  { %v534_v41 = vmul.f32 1.442695, %v532_v40 }
 0x669   :  { %v531_v42 = vpop.xlane.xlu0 %530 }
 0x66a   :  { %1140 = vpow2.f32 %v534_v41  ;;  %v533_v43 = vsub.f32 %v525_v37, %v531_v42 }
 0x66c   :  { %v536_v44 = vmul.f32 1.442695, %v533_v43 }
 0x66e   :  { %1142 = vpow2.f32 %v536_v44 }
 0x677   :  { %v1141_v45 = vpop.eup %1140 }
 0x678   :  { %v538_v46 = vsel %vm278_vm3, %v1141_v45, 0.0 }
 0x679   :  { %539 = vadd.xlane.f32.xlu0 %v538_v46 }
 0x67b   :  { %v1143_v47 = vpop.eup %1142 }
 0x67c   :  { %v541_v48 = vsel %vm278_vm3, %v1143_v47, 0.0 }
 0x67d   :  { %542 = vadd.xlane.f32.xlu0 %v541_v48 }
 0x702   :  { %v540_v54 = vpop.xlane.xlu0 %539 }
 0x703   :  { %1144 = vrcp.f32 %v540_v54 }
 0x706   :  { %v543_v55 = vpop.xlane.xlu0 %542 }
 0x707   :  { %1146 = vrcp.f32 %v543_v55 }
 0x710   :  { %v1145_v56 = vpop.eup %1144 }
 0x711   :  { %v546_v58 = vmul.f32 %v1145_v56, %v1141_v45 }
 0x714   :  { %v1147_v57 = vpop.eup %1146 }
 0x715   :  { %v547_v59 = vmul.f32 %v1147_v57, %v1143_v47 }
 0x717   :  { %v548_v60 = vpack.c.bf16 %v547_v59, %v546_v58  ;;  %v849_v59 = vld [vmem:[#allocation5] sm:$0xff] }
 0x719   :  { %1051 = vmatmul.mubr.msk.bf16.vlgmr.msra.gmra.mxu0 %vm278_vm3, %v548_v60 }
 0x71a   :  { %1076 = vmatprep.mubr.msk.bf16.mxu0 %vm1272_vm0, %v1271_v0 }
 0x7d9   :  { %v593_v3 = vpop.f32.mrf.mxu0 }
 0x7da   :  { %v594_v5 = vadd.f32 %v949_v2, %v593_v3 }
 0x7db   :  { %v1052_v4 = vpop.f32.mrf.mxu0 }
 0x7dc   :  { %v600_v9 = vmax.f32 %v594_v5, 0.0 }
 0x7dd   :  { %v596_v6 = vpop.f32.mrf.mxu0 }
 0x7de   :  { %v597_v7 = vadd.f32 %v949_v2, %v596_v6 }
 0x7df   :  { %v1053_v8 = vpop.f32.mrf.mxu0 }
 0x7e0   :  { %v601_v10 = vmax.f32 %v597_v7, 0.0 }
 0x7e2   :  { %v619_v11 = vpack.c.bf16 %v601_v10, %v600_v9 }
 0x7e4   :  { %1071 = vmatmul.mubr.bf16.vlgmr.msra.gmra.mxu1 %v619_v11 }
 0x8a4   :  { %v702_v12 = vpop.f32.mrf.mxu1 }
 0x8a5   :  { %754 = vperm.xlu1 %1106, %v702_v12   ;;  %715 = vrot.lane.b32.xlu0 %v702_v12, %s1278_s18 }
 0x8a6   :  { %v1072_v13 = vpop.f32.mrf.mxu1 }
 0x8a8   :  { %v705_v14 = vpop.f32.mrf.mxu1 }
 0x8a9   :  { %v796_v15 = vpack.c.bf16 %v705_v14, %v702_v12  ;;  %717 = vrot.lane.b32.xlu0 %v705_v14, %s1278_s18 }
 0x8aa   :  { %v1073_v16 = vpop.f32.mrf.mxu1 }
 0x8ab   :  { %1075 = vmatpush3.bf16.msra.mxu0 %v796_v15 }
 0x8ac   :  { %1080 = vmatprep.subr.mxu0 %v1271_v0 }
 0x8ad   :  { %758 = vperm.xlu0 %1107, %v705_v14  }
 0x917   :  { %v716_v17 = vpop.permute.xlu0 %715 }
 0x918   :  { %721 = vxpose.xlu0.b32.start [1/2] (short) (narrow) %v716_v17, 8 }
 0x91b   :  { %v718_v18 = vpop.permute.xlu0 %717 }
 0x91c   :  { %722 = vxpose.xlu0.b32.end [2/2] (short) (narrow) %v718_v18, 8 }
 0x920   :  { %v755_v22 = vpop.permute.xlu1 %754 }
 0x928   :  { %v759_v19 = vpop.permute.xlu0 %758 }
 0x994   :  { %v737_v20 = vpop.trf.xlu0 }
 0x995   :  { %v764_v21 = vrot.slane %v737_v20, %v1370_v23 }
 0x997   :  { %v765_v24 = vadd.f32 %v764_v21, %v755_v22  ;;  %v766_v25 = vadd.f32 %v764_v21, %v759_v19 }
 0x999   :  { %v767_v26 = vmul.f32 0.2, %v765_v24  ;;  %v768_v27 = vmul.f32 0.2, %v766_v25 }
 0x99b   :  { %v770_v28 = vmax.f32 %v766_v25, %v768_v27  ;;  %v769_v29 = vmax.f32 %v765_v24, %v767_v26 }
 0x99d   :  { %v772_v30 = vsel %vm1376_vm1, %v770_v28, -1e+30  ;;  %v771_v31 = vsel %vm1380_vm2, %v769_v29, -1e+30 }
 0x99e   :  { %v776_v32 = vsel %vm278_vm3, %v772_v30, -inf  ;;  %v773_v33 = vsel %vm278_vm3, %v771_v31, -inf }
 0x99f   :  { %777 = vmax.xlane.f32.xlu0 %v776_v32  ;;  %774 = vmax.xlane.f32.xlu1 %v773_v33 }
 0xa28   :  { %v778_v23 = vpop.xlane.xlu0 %777  ;;  %v775_v36 = vpop.xlane.xlu1 %774 }
 0xa29   :  { %v780_v37 = vsub.f32 %v772_v30, %v778_v23  ;;  %v779_v38 = vsub.f32 %v771_v31, %v775_v36 }
 0xa2b   :  { %v781_v39 = vmul.f32 1.442695, %v779_v38  ;;  %v783_v40 = vmul.f32 1.442695, %v780_v37 }
 0xa2d   :  { %1148 = vpow2.f32 %v781_v39 }
 0xa2e   :  { %1150 = vpow2.f32 %v783_v40 }
 0xa3a   :  { %v1149_v41 = vpop.eup %1148 }
 0xa3b   :  { %v785_v34 = vsel %vm278_vm3, %v1149_v41, 0.0  ;;  %v1151_v42 = vpop.eup %1150 }
 0xa3c   :  { %786 = vadd.xlane.f32.xlu1 %v785_v34  ;;  %v788_v35 = vsel %vm278_vm3, %v1151_v42, 0.0 }
 0xa40   :  { %789 = vadd.xlane.f32.xlu1 %v788_v35 }
 0xac5   :  { %v787_v43 = vpop.xlane.xlu1 %786 }
 0xac6   :  { %1152 = vrcp.f32 %v787_v43 }
 0xac9   :  { %v790_v44 = vpop.xlane.xlu1 %789 }
 0xaca   :  { %1154 = vrcp.f32 %v790_v44 }
 0xad3   :  { %v1153_v45 = vpop.eup %1152 }
 0xad4   :  { %v793_v48 = vmul.f32 %v1153_v45, %v1149_v41 }
 0xad7   :  { %v1155_v46 = vpop.eup %1154 }
 0xad8   :  { %v794_v47 = vmul.f32 %v1155_v46, %v1151_v42 }
 0xada   :  { %v795_v49 = vpack.c.bf16 %v794_v47, %v793_v48 }
 0xadc   :  { %1077 = vmatmul.mubr.msk.bf16.vlgmr.msra.gmra.mxu0 %vm278_vm3, %v795_v49 }
 0xadd   :  { %1084 = vmatprep.mubr.msk.f32.mxu0 %vm1272_vm0, %v1271_v0 }
 0xb9c   :  { %v840_v50 = vpop.f32.mrf.mxu0 }
 0xb9d   :  { %v841_v54 = vadd.f32 %v959_v51, %v840_v50 }
 0xb9e   :  { %v1078_v52 = vpop.f32.mrf.mxu0 }
 0xb9f   :  { %v847_v58 = vmax.f32 %v841_v54, 0.0 }
 0xba0   :  { %v843_v53 = vpop.f32.mrf.mxu0 }
 0xba1   :  { %v844_v55 = vadd.f32 %v959_v51, %v843_v53 }
 0xba2   :  { %v1079_v56 = vpop.f32.mrf.mxu0 }
 0xba3   :  { %v848_v57 = vmax.f32 %v844_v55, 0.0 }
 0xba5   :  { %1081 = vmatpush3.msra.mxu0 %v848_v57 }
 0xba6   :  { %1082 = vmatprep.subr.mxu0 %v1271_v0 }
 0xba7   :  { %1083 = vmatpush3.msra.mxu0 %v847_v58 }
 0xba8   :  { %1085 = vmatmul.mubr.msk.f32.vlgmr.msra.gmra.mxu0 %vm278_vm3, %v849_v59 }
 0xc68   :  { %v919_v60 = vpop.f32.mrf.mxu0 }
 0xc69   :  { %923 = vst [vmem:[%s1461_s9] sm:$0xff] %v919_v60 }
 0xc6a   :  { %v1086_v61 = vpop.f32.mrf.mxu0 }
 0xc6b   :  { %928 = vsyncpa [#allocation4], 1 }
 0xc6c   :  { %929 = vsyncpa [#allocation6], 1 }
 0xc6d   :  { %930 = vsyncpa [#allocation9], 1 }

</bundles_post_ra>
